<compile_context>
chip_gen: v7x
topology: tpu7x:2x2x1
jax: 0.10.0
libtpu: 0.0.40
codegen_flags: <defaults>
</compile_context>

<pallas_src>
import functools

import jax
import jax.numpy as jnp
from jax.experimental import pallas as pl
from jax.experimental.pallas import tpu as pltpu

NUM_BASIS = 8          # module default
R_MAX = 5.0            # kept for parity with __init__; not used in forward
_LANE = 128


def _chebychev_kernel(x_ref, o_ref, *, num_basis):
    """Compute T_1(x) .. T_{num_basis}(x) for one lane-dense tile of rows.

    x_ref: (1, tile_n)            rows on lanes
    o_ref: (num_basis, tile_n)    basis order on sublanes, rows on lanes

    Uses the standard three-term recurrence
        T_0 = 1, T_1 = x, T_{k+1} = 2 x T_k - T_{k-1}
    which matches torch.special.chebyshev_polynomial_t for integer orders
    on the Chebyshev domain |x| <= 1 (up to float rounding).
    """
    x = x_ref[...]                      # (1, tile_n) float32
    t_prev = jnp.ones_like(x)           # T_0
    t_curr = x                          # T_1
    rows = [t_curr]
    for _ in range(num_basis - 1):      # static unroll over basis orders
        t_next = 2.0 * x * t_curr - t_prev
        t_prev, t_curr = t_curr, t_next
        rows.append(t_curr)
    # Stack along the sublane axis and do one full (unmasked) tile write.
    o_ref[...] = jnp.concatenate(rows, axis=0)   # (num_basis, tile_n)


def chebychev_basis(x, num_basis=NUM_BASIS, tile_n=2048):
    """Pallas wrapper. x: [N, 1] -> out: [N, num_basis] (matches PyTorch)."""
    assert x.ndim == 2 and x.shape[1] == 1, "expected x of shape [N, 1]"
    n_rows = x.shape[0]
    dtype = x.dtype

    # tile_n: multiple of 128, at least 128, no bigger than the padded row count.
    tile_n = max(_LANE, (int(tile_n) // _LANE) * _LANE)
    tile_n = min(tile_n, pl.cdiv(n_rows, _LANE) * _LANE)

    # Pad rows up to a multiple of tile_n (padding is sliced off afterwards).
    n_pad = pl.cdiv(n_rows, tile_n) * tile_n
    x_lane = jnp.pad(x.reshape(1, n_rows), ((0, 0), (0, n_pad - n_rows)))

    kernel = functools.partial(_chebychev_kernel, num_basis=num_basis)
    out_t = pl.pallas_call(
        kernel,
        out_shape=jax.ShapeDtypeStruct((num_basis, n_pad), dtype),
        grid=(n_pad // tile_n,),
        in_specs=[pl.BlockSpec((1, tile_n), lambda i: (0, i))],
        out_specs=pl.BlockSpec((num_basis, tile_n), lambda i: (0, i)),
        compiler_params=pltpu.CompilerParams(
            dimension_semantics=("parallel",)),
    )(x_lane)

    # Back to the module's [N, num_basis] layout.
    return out_t[:, :n_rows].T


if __name__ == "__main__":
    key = jax.random.PRNGKey(0)
    N = 200  # deliberately not a multiple of 128/tile_n to exercise padding
    # Distances normalized into [-1, 1] (Chebyshev domain), deterministic.
    x = jax.random.uniform(key, (N, 1), dtype=jnp.float32,
                           minval=-1.0, maxval=1.0)

    out = chebychev_basis(x, num_basis=NUM_BASIS)
    out = jax.block_until_ready(out)

    # Pure-JAX reference: T_n(x) = cos(n * arccos(x)) for |x| <= 1, n = 1..8
    n = jnp.arange(1, NUM_BASIS + 1, dtype=jnp.float32)[None, :]   # [1, num_basis]
    ref = jnp.cos(n * jnp.arccos(jnp.clip(x, -1.0, 1.0)))           # [N, num_basis]

    assert out.shape == (N, NUM_BASIS)
    assert jnp.allclose(out, ref, atol=1e-4), "mismatch vs reference"
    print("KERNEL_OK")
</pallas_src>

<mosaic_0001>
module attributes {stable_mosaic.version = 11 : i64} {
  func.func @_chebychev_kernel(%arg0: i32, %arg1: memref<1x256xf32, #tpu.memory_space<vmem>>, %arg2: memref<8x256xf32, #tpu.memory_space<vmem>>) attributes {dimension_semantics = [#tpu.dimension_semantics<parallel>], iteration_bounds = array<i64: 1>, scalar_prefetch = 0 : i64, scratch_operands = 0 : i64, tpu.core_type = #tpu.core_type<tc>, window_params = [{transform_indices = @transform_0, window_bounds = array<i64: 1, 256>}, {transform_indices = @transform_1, window_bounds = array<i64: 8, 256>}]} {
    %c0 = arith.constant 0 : index
    %c0_0 = arith.constant 0 : index
    %0 = vector.load %arg1[%c0, %c0_0] : memref<1x256xf32, #tpu.memory_space<vmem>>, vector<1x256xf32>
    %cst = arith.constant 1.000000e+00 : f32
    %1 = vector.broadcast %cst : f32 to vector<1x256xf32>
    %cst_1 = arith.constant 2.000000e+00 : f32
    %2 = vector.broadcast %cst_1 : f32 to vector<1x256xf32>
    %3 = arith.mulf %2, %0 : vector<1x256xf32>
    %4 = arith.mulf %3, %0 : vector<1x256xf32>
    %5 = arith.subf %4, %1 : vector<1x256xf32>
    %cst_2 = arith.constant 2.000000e+00 : f32
    %6 = vector.broadcast %cst_2 : f32 to vector<1x256xf32>
    %7 = arith.mulf %6, %0 : vector<1x256xf32>
    %8 = arith.mulf %7, %5 : vector<1x256xf32>
    %9 = arith.subf %8, %0 : vector<1x256xf32>
    %cst_3 = arith.constant 2.000000e+00 : f32
    %10 = vector.broadcast %cst_3 : f32 to vector<1x256xf32>
    %11 = arith.mulf %10, %0 : vector<1x256xf32>
    %12 = arith.mulf %11, %9 : vector<1x256xf32>
    %13 = arith.subf %12, %5 : vector<1x256xf32>
    %cst_4 = arith.constant 2.000000e+00 : f32
    %14 = vector.broadcast %cst_4 : f32 to vector<1x256xf32>
    %15 = arith.mulf %14, %0 : vector<1x256xf32>
    %16 = arith.mulf %15, %13 : vector<1x256xf32>
    %17 = arith.subf %16, %9 : vector<1x256xf32>
    %cst_5 = arith.constant 2.000000e+00 : f32
    %18 = vector.broadcast %cst_5 : f32 to vector<1x256xf32>
    %19 = arith.mulf %18, %0 : vector<1x256xf32>
    %20 = arith.mulf %19, %17 : vector<1x256xf32>
    %21 = arith.subf %20, %13 : vector<1x256xf32>
    %cst_6 = arith.constant 2.000000e+00 : f32
    %22 = vector.broadcast %cst_6 : f32 to vector<1x256xf32>
    %23 = arith.mulf %22, %0 : vector<1x256xf32>
    %24 = arith.mulf %23, %21 : vector<1x256xf32>
    %25 = arith.subf %24, %17 : vector<1x256xf32>
    %cst_7 = arith.constant 2.000000e+00 : f32
    %26 = vector.broadcast %cst_7 : f32 to vector<1x256xf32>
    %27 = arith.mulf %26, %0 : vector<1x256xf32>
    %28 = arith.mulf %27, %25 : vector<1x256xf32>
    %29 = arith.subf %28, %21 : vector<1x256xf32>
    %30 = tpu.concatenate %0, %5, %9, %13, %17, %21, %25, %29 in 0 : vector<1x256xf32>, vector<1x256xf32>, vector<1x256xf32>, vector<1x256xf32>, vector<1x256xf32>, vector<1x256xf32>, vector<1x256xf32>, vector<1x256xf32> -> vector<8x256xf32>
    %c0_8 = arith.constant 0 : index
    %c0_9 = arith.constant 0 : index
    %31 = vector.load %arg2[%c0_8, %c0_9] : memref<8x256xf32, #tpu.memory_space<vmem>>, vector<8x256xf32>
    tpu.vector_store %arg2[%c0_8, %c0_9], %30 {strides = array<i32>} : memref<8x256xf32, #tpu.memory_space<vmem>>, vector<8x256xf32>,
    return
  }
  func.func @transform_0(%arg0: i32) -> (i32, i32) {
    %c0_i32 = arith.constant 0 : i32
    %c0_i32_0 = arith.constant 0 : i32
    return %c0_i32, %arg0 : i32, i32
  }
  func.func @transform_1(%arg0: i32) -> (i32, i32) {
    %c0_i32 = arith.constant 0 : i32
    %c0_i32_0 = arith.constant 0 : i32
    return %c0_i32, %arg0 : i32, i32
  }
}

</mosaic_0001>

<bundles_post_ra>
// kernel: tpu_custom_call.1
= control target key start
LH: loop header
LB: loop body
LE: loop exit
PB: predicated region body
PF: predicated region fallthrough
CT: control target
= control target key end

     0   :  { %6 = vsyncpa [#allocation3], 0  ;;  %s250_s0 = inlined_call_operand.hbm [shape: f32[1,256], index: 0, kind: input, shape index: {}]   ;;  %s251_s1 = inlined_call_operand.hbm [shape: f32[8,256], index: 1, kind: output, shape index: {}]  }
   0x1   :  { %7 = vsyncpa [#allocation4], 0  ;;  %s214_s6 = smov [#allocation2]   ;;  %s166_s10 = scalar_lea.hbm %s250_s0, 32 }
   0x2   :  { %s14_s7 = sshll.u32 %s214_s6, 4  ;;  %p167_p0 = scmp.ne.s32.totalorder %s250_s0, %s166_s10  ;;  %s15_s7 = int_to_ptr.vmem [resolvable:$true] %s14_s7 }
   0x3   :  { %p170_p1 = scmp.lt.u32.totalorder %s166_s10, %s250_s0 }
   0x5   :  { %p172_p2 = pnand %p170_p1, %p167_p0 }
   0x7   :  { %175 = shalt.err (!%p172_p2)
}
   0x8   :  { %s176_s15 = scalar_lea.vmem %s15_s7, 32  ;;  %p181_p4 = scmp.lt.s32.totalorder %s15_s7, %s15_s7 }
   0x9   :  { %p177_p3 = scmp.ne.s32.totalorder %s15_s7, %s176_s15  ;;  %p182_p5 = scmp.lt.s32.totalorder %s176_s15, %s176_s15 }
   0xb   :  { %p183_p6 = por %p182_p5, %p181_p4 }
   0xd   :  { %p184_p7 = pnand %p183_p6, %p177_p3 }
   0xf   :  { %187 = shalt.err (!%p184_p7)
}
  0x10   :  { %17 = dma.hbm_to_vmem [thread:$0]  %s250_s0, 32, %s15_s7, [#allocation3]  }
  0x11   :  { %210 = dma.done.wait [#allocation3], 32  }
  0x12   :  { %211 = vsyncadd [#allocation3], 4294967264  ;;  %v38_v0 = vlaneseq  ;;  %v21_v1 = vld [vmem:[#allocation2] sm:$0x3]  ;;  %vm125_vm0 = vcmask 1040384   ;;  %vm128_vm1 = vcmask 1041408  }
  0x13   :  { %v22_v2 = vmul.f32 2.0, %v21_v1  ;;  %vm131_vm2 = vcmask 1042432   ;;  %vm134_vm3 = vcmask 1043456   ;;  %vm137_vm4 = vcmask 1044480   ;;  %s215_s0 = smov [#allocation5]  }
  0x14   :  { %v39_v3 = vshrl.u32 %v38_v0, 7  ;;  %vm140_vm5 = vcmask 1045504   ;;  %s154_s18 = sshll.u32 %s215_s0, 4  ;;  %vm143_vm6 = vcmask 1046528   ;;  %s155_s18 = int_to_ptr.vmem [resolvable:$true] %s154_s18 }
  0x15   :  { %v23_v4 = vmul.f32 %v22_v2, %v21_v1  ;;  %s188_s19 = scalar_lea.vmem %s155_s18, 256  ;;  %p193_p9 = scmp.lt.s32.totalorder %s155_s18, %s155_s18 }
  0x16   :  { %v40_v6 = vsub.s32 0, %v39_v3  ;;  %v44_v8 = vsub.s32 1, %v39_v3  ;;  %p189_p8 = scmp.ne.s32.totalorder %s155_s18, %s188_s19  ;;  %p194_p10 = scmp.lt.s32.totalorder %s188_s19, %s188_s19 }
  0x17   :  { %v163_v5 = vadd.f32 -1.0, %v23_v4 }
  0x18   :  { %v41_v10 = vrot.slane %v21_v1, %v40_v6  ;;  %v45_v13 = vrot.slane %v21_v1, %v44_v8  ;;  %p195_p11 = por %p194_p10, %p193_p9 }
  0x19   :  { %v25_v7 = vmul.f32 %v163_v5, %v22_v2  ;;  %v52_v11 = vrot.slane %v163_v5, %v40_v6  ;;  %v56_v14 = vrot.slane %v163_v5, %v44_v8 }
  0x1a   :  { %p196_p12 = pnand %p195_p11, %p189_p8 }
  0x1b   :  { %v26_v9 = vsub.f32 %v25_v7, %v21_v1  ;;  %v126_v17 = vsel %vm125_vm0, %v41_v10, %v52_v11  ;;  %v127_v20 = vsel %vm125_vm0, %v45_v13, %v56_v14 }
  0x1d   :  { %v27_v12 = vmul.f32 %v26_v9, %v22_v2  ;;  %v63_v16 = vrot.slane %v26_v9, %v40_v6  ;;  %v67_v18 = vrot.slane %v26_v9, %v44_v8 }
  0x1f   :  { %v28_v15 = vsub.f32 %v27_v12, %v163_v5  ;;  %v129_v23 = vsel %vm128_vm1, %v126_v17, %v63_v16  ;;  %v130_v25 = vsel %vm128_vm1, %v127_v20, %v67_v18 }
  0x21   :  { %v29_v19 = vmul.f32 %v28_v15, %v22_v2  ;;  %v74_v21 = vrot.slane %v28_v15, %v40_v6  ;;  %v78_v24 = vrot.slane %v28_v15, %v44_v8 }
  0x23   :  { %v30_v22 = vsub.f32 %v29_v19, %v26_v9  ;;  %v132_v28 = vsel %vm131_vm2, %v129_v23, %v74_v21  ;;  %v133_v31 = vsel %vm131_vm2, %v130_v25, %v78_v24 }
  0x25   :  { %v31_v26 = vmul.f32 %v30_v22, %v22_v2  ;;  %v85_v27 = vrot.slane %v30_v22, %v40_v6  ;;  %v89_v29 = vrot.slane %v30_v22, %v44_v8 }
  0x27   :  { %v32_v30 = vsub.f32 %v31_v26, %v28_v15  ;;  %v135_v34 = vsel %vm134_vm3, %v132_v28, %v85_v27  ;;  %v136_v36 = vsel %vm134_vm3, %v133_v31, %v89_v29 }
  0x29   :  { %v33_v32 = vmul.f32 %v32_v30, %v22_v2  ;;  %v96_v33 = vrot.slane %v32_v30, %v40_v6  ;;  %v100_v35 = vrot.slane %v32_v30, %v44_v8 }
  0x2b   :  { %v34_v37 = vsub.f32 %v33_v32, %v30_v22  ;;  %v138_v38 = vsel %vm137_vm4, %v135_v34, %v96_v33  ;;  %v139_v42 = vsel %vm137_vm4, %v136_v36, %v100_v35 }
  0x2d   :  { %v35_v39 = vmul.f32 %v34_v37, %v22_v2  ;;  %v107_v40 = vrot.slane %v34_v37, %v40_v6  ;;  %v111_v41 = vrot.slane %v34_v37, %v44_v8 }
  0x2f   :  { %v36_v43 = vsub.f32 %v35_v39, %v32_v30  ;;  %v141_v44 = vsel %vm140_vm5, %v138_v38, %v107_v40  ;;  %v142_v45 = vsel %vm140_vm5, %v139_v42, %v111_v41 }
  0x31   :  { %v118_v46 = vrot.slane %v36_v43, %v40_v6  ;;  %v122_v47 = vrot.slane %v36_v43, %v44_v8 }
  0x33   :  { %v144_v48 = vsel %vm143_vm6, %v141_v44, %v118_v46  ;;  %v145_v49 = vsel %vm143_vm6, %v142_v45, %v122_v47 }
  0x34   :  { %146 = vst [vmem:[#allocation5] sm:$0xff] %v144_v48  ;;  %147 = vst [vmem:[#allocation5 + $0x8] sm:$0xff] %v145_v49 }
  0x35   :  { %199 = shalt.err (!%p196_p12)
}
  0x36   :  { %s200_s22 = scalar_lea.hbm %s251_s1, 256 }
  0x37   :  { %p201_p13 = scmp.ne.s32.totalorder %s251_s1, %s200_s22  ;;  %p204_p0 = scmp.lt.u32.totalorder %s200_s22, %s251_s1 }
  0x39   :  { %p206_p1 = pnand %p204_p0, %p201_p13 }
  0x3b   :  { %209 = shalt.err (!%p206_p1)
}
  0x3c   :  { %157 = dma.vmem_to_hbm [thread:$0]  %s155_s18, 256, %s251_s1, [#allocation4]  }
  0x3d   :  { %212 = dma.done.wait [#allocation4], 256  }
  0x3e   :  { %213 = vsyncadd [#allocation4], 4294967040 }
  0x3f   :  { %161 = vsyncpa [#allocation3], 1 }
  0x40   :  { %162 = vsyncpa [#allocation4], 1 }

</bundles_post_ra>
